<compile_context>
chip_gen: v7x
topology: tpu7x:2x2x1
jax: 0.10.0
libtpu: 0.0.40
codegen_flags: <defaults>
</compile_context>

<pallas_src>
import functools

import jax
import jax.numpy as jnp
from jax.experimental import pallas as pl
from jax.experimental.pallas import tpu as pltpu

IN_FEATURES = 2
OUT_FEATURES = 1

# Rows of 128 interleaved values (= 64 batch elements) per grid step.
# 8192 rows -> 512K batch elems / ~6 MiB of HBM traffic per step.
DEFAULT_TILE_R = 8192


def _round_up(a, m):
    return ((a + m - 1) // m) * m


def linear_kernel(b_ref, x_ref, w_ref, o_ref):
    # b_ref: SMEM (1,)           f32  bias
    # x_ref: VMEM (TILE_R, 128)       64 batch elements per row, features interleaved
    # w_ref: VMEM (128, 64)      f32  "deinterleave + weight" matrix (resident)
    # o_ref: VMEM (TILE_R, 64)   f32  one y per batch element, already lane-compacted
    x = x_ref[...].astype(jnp.float32)
    o_ref[...] = (
        jnp.dot(
            x,
            w_ref[...],
            precision=jax.lax.Precision.HIGHEST,
            preferred_element_type=jnp.float32,
        )
        + b_ref[0]
    )


@functools.partial(jax.jit, static_argnames=("tile_r",))
def primer_red_forward(x, weight, bias, *, tile_r=DEFAULT_TILE_R):
    """PrimerRed forward: y = x @ weight.T + bias.

    x:      (B, 2) float (f32 or bf16)
    weight: (1, 2) f32   (PyTorch nn.Linear layout)
    bias:   (1,)   f32
    returns (B, 1) f32
    """
    assert x.ndim == 2 and x.shape[1] == IN_FEATURES
    B = x.shape[0]
    tile_r = int(tile_r)
    assert tile_r >= 8 and tile_r % 8 == 0, "tile_r must be a positive multiple of 8"

    # 64 batch elements per 128-lane row.  Fast path needs B % 64 == 0; otherwise pad
    # (slow fallback: one extra copy of x).
    # TODO(synk): handle the ragged tail without the pad copy (tail-only kernel call).
    B64 = _round_up(B, 64)
    if B64 != B:
        x = jnp.pad(x, ((0, B64 - B), (0, 0)))
    R = B64 // 64
    x2 = x.reshape(R, 128)  # free: row-major reshape, no data movement

    # Shrink the tile to the array, and keep >= 2 grid steps when there is enough
    # work so the "parallel" axis can be split across v7x's two TensorCores.
    tile_r = min(tile_r, _round_up(R, 8))
    if R >= 16:
        tile_r = min(tile_r, _round_up(pl.cdiv(R, 2), 8))
    n_tiles = pl.cdiv(R, tile_r)

    # W_big[2j, j] = w0, W_big[2j+1, j] = w1: folds the lane deinterleave into the dot.
    w = weight.astype(jnp.float32).reshape(IN_FEATURES)
    eye = jnp.eye(64, dtype=jnp.float32)
    w_big = jnp.stack([w[0] * eye, w[1] * eye], axis=1).reshape(128, 64)
    b = bias.astype(jnp.float32).reshape(1)

    # Double-buffered in/out blocks + resident weights; keep under v7x's VMEM budget.
    elem_bytes = jnp.dtype(x.dtype).itemsize
    block_bytes = tile_r * (128 * elem_bytes + 64 * 4)
    vmem_need = 2 * block_bytes + 2 * (128 * 64 * 4) + (1 << 20)
    assert vmem_need <= (48 << 20), "tile_r too large for the v7x VMEM budget"
    vmem_limit = int(max(32 << 20, vmem_need))

    out = pl.pallas_call(
        linear_kernel,
        out_shape=jax.ShapeDtypeStruct((R, 64), jnp.float32),
        grid_spec=pltpu.PrefetchScalarGridSpec(
            num_scalar_prefetch=0,
            grid=(n_tiles,),
            in_specs=[
                # bias: one scalar straight into SMEM (no padded VMEM tile).
                pl.BlockSpec(memory_space=pltpu.MemorySpace.SMEM),
                # x rows: sublane/lane-dense (TILE_R, 128) blocks, double-buffered.
                pl.BlockSpec((tile_r, 128), lambda i: (i, 0)),
                # deinterleave+weight matrix: 32 KiB, resident across all steps.
                pl.BlockSpec((128, 64), lambda i: (0, 0)),
            ],
            out_specs=pl.BlockSpec((tile_r, 64), lambda i: (i, 0)),
        ),
        compiler_params=pltpu.CompilerParams(
            dimension_semantics=("parallel",),
            vmem_limit_bytes=vmem_limit,
        ),
        cost_estimate=pl.CostEstimate(
            flops=4 * B64,
            transcendentals=0,
            bytes_accessed=int(B64 * IN_FEATURES * elem_bytes + B64 * 4 + 128 * 64 * 4),
        ),
    )(b, x2, w_big)

    # Free reshapes + (possibly elided) tail slice back to the (B, 1) PyTorch shape.
    return out.reshape(B64)[:B].reshape(B, OUT_FEATURES)


if __name__ == "__main__":
    key = jax.random.PRNGKey(0)
    kx1, kx2, kw, kb = jax.random.split(key, 4)

    # PyTorch-style init: uniform(-1/sqrt(in_features), 1/sqrt(in_features)).
    bound = 1.0 / (IN_FEATURES ** 0.5)
    weight = jax.random.uniform(kw, (OUT_FEATURES, IN_FEATURES),
                                minval=-bound, maxval=bound, dtype=jnp.float32)
    bias = jax.random.uniform(kb, (OUT_FEATURES,),
                              minval=-bound, maxval=bound, dtype=jnp.float32)

    # Case 1: B multiple of 64 (zero-copy path), small tile_r to force a multi-step
    # grid (R=20 rows, 3 steps) with a row overhang in the last block.
    B1 = 1280
    x1 = jax.random.normal(kx1, (B1, IN_FEATURES), dtype=jnp.float32)
    y1 = primer_red_forward(x1, weight, bias, tile_r=8)
    jax.block_until_ready(y1)
    ref1 = x1 @ weight.T + bias
    assert y1.shape == (B1, OUT_FEATURES)
    assert jnp.allclose(y1, ref1, atol=1e-5, rtol=1e-5), "case 1 mismatch vs reference"

    # Case 2: B not a multiple of 64 -> pad fallback, default tile, single grid step.
    B2 = 300
    x2 = jax.random.normal(kx2, (B2, IN_FEATURES), dtype=jnp.float32)
    y2 = primer_red_forward(x2, weight, bias)
    jax.block_until_ready(y2)
    ref2 = x2 @ weight.T + bias
    assert y2.shape == (B2, OUT_FEATURES)
    assert jnp.allclose(y2, ref2, atol=1e-5, rtol=1e-5), "case 2 mismatch vs reference"

    print("KERNEL_OK")
</pallas_src>

<mosaic_0001>
module attributes {stable_mosaic.version = 11 : i64} {
  func.func @linear_kernel(%arg0: i32, %arg1: memref<1xf32, #tpu.memory_space<smem>>, %arg2: memref<8x128xf32, #tpu.memory_space<vmem>>, %arg3: memref<128x64xf32, #tpu.memory_space<vmem>>, %arg4: memref<8x64xf32, #tpu.memory_space<vmem>>) attributes {dimension_semantics = [#tpu.dimension_semantics<parallel>], iteration_bounds = array<i64: 3>, scalar_prefetch = 0 : i64, scratch_operands = 0 : i64, tpu.core_type = #tpu.core_type<tc>, window_params = [{transform_indices = @transform_0, window_bounds = array<i64: 1>}, {transform_indices = @transform_1, window_bounds = array<i64: 8, 128>}, {pipeline_mode = #tpu.pipeline_mode<synchronous>, transform_indices = @transform_2, window_bounds = array<i64: 128, 64>}, {transform_indices = @transform_3, window_bounds = array<i64: 8, 64>}]} {
    %c0 = arith.constant 0 : index
    %c0_0 = arith.constant 0 : index
    %0 = vector.load %arg2[%c0, %c0_0] : memref<8x128xf32, #tpu.memory_space<vmem>>, vector<8x128xf32>
    %c0_1 = arith.constant 0 : index
    %c0_2 = arith.constant 0 : index
    %1 = vector.load %arg3[%c0_1, %c0_2] : memref<128x64xf32, #tpu.memory_space<vmem>>, vector<128x64xf32>
    %cst = arith.constant dense<0.000000e+00> : vector<8x64xf32>
    %2 = tpu.matmul %0, %1, %cst {dimension_numbers = #tpu.dot_dimension_numbers<[1], [0], [0], [1], [0, 0, 1, 1], [], []>, precision = #tpu.contract_precision<fp32>} : vector<8x128xf32>, vector<128x64xf32>, vector<8x64xf32> -> vector<8x64xf32>
    %c0_3 = arith.constant 0 : index
    %3 = memref.load %arg1[%c0_3] : memref<1xf32, #tpu.memory_space<smem>>
    %4 = vector.broadcast %3 : f32 to vector<8x64xf32>
    %5 = arith.addf %2, %4 : vector<8x64xf32>
    %c0_4 = arith.constant 0 : index
    %c0_5 = arith.constant 0 : index
    %6 = vector.load %arg4[%c0_4, %c0_5] : memref<8x64xf32, #tpu.memory_space<vmem>>, vector<8x64xf32>
    tpu.vector_store %arg4[%c0_4, %c0_5], %5 {strides = array<i32>} : memref<8x64xf32, #tpu.memory_space<vmem>>, vector<8x64xf32>,
    return
  }
  func.func @transform_0(%arg0: i32) -> i32 {
    %c0_i32 = arith.constant 0 : i32
    %c0_i32_0 = arith.constant 0 : i32
    return %c0_i32 : i32
  }
  func.func @transform_1(%arg0: i32) -> (i32, i32) {
    %c0_i32 = arith.constant 0 : i32
    %c0_i32_0 = arith.constant 0 : i32
    return %arg0, %c0_i32 : i32, i32
  }
  func.func @transform_2(%arg0: i32) -> (i32, i32) {
    %c0_i32 = arith.constant 0 : i32
    %c0_i32_0 = arith.constant 0 : i32
    %c0_i32_1 = arith.constant 0 : i32
    return %c0_i32, %c0_i32_0 : i32, i32
  }
  func.func @transform_3(%arg0: i32) -> (i32, i32) {
    %c0_i32 = arith.constant 0 : i32
    %c0_i32_0 = arith.constant 0 : i32
    return %arg0, %c0_i32 : i32, i32
  }
}

</mosaic_0001>

<bundles_post_ra>
// kernel: primer_red_forward.1
= control target key start
LH: loop header
LB: loop body
LE: loop exit
PB: predicated region body
PF: predicated region fallthrough
CT: control target
= control target key end

     0   :  { %s1402_s14 = smov 0   ;;  %s1737_s0 = inlined_call_operand.<no memory space> [shape: f32[1], index: 0, kind: input, shape index: {}]   ;;  %s1738_s1 = inlined_call_operand.vmem [shape: f32[20,128], index: 1, kind: input, shape index: {}]   ;;  %s1739_s2 = inlined_call_operand.vmem [shape: f32[128,64], index: 2, kind: input, shape index: {}]   ;;  %s1740_s3 = inlined_call_operand.vmem [shape: f32[20,64], index: 3, kind: output, shape index: {}]  }
   0x1   :  { %8 = sst [smem:[#allocation2]] %s1737_s0 }
   0x2 LB: > { %s882_s15 = sadd.s32 4294967295, %s1374_s14   ;;  %p886_p0 = scmp.ge.s32.totalorder %s1374_s14, 1  ;;  %s1374_s14 = sphi %s1402_s14, %s14_s14  }
   0x3   : > { %p137_p1 = scmp.lt.s32.totalorder %s1374_s14, 4 }
   0x5   : > { %p138_p2 = pnand %p886_p0, %p137_p1 }
   0x6   : > { %v168_v0 = vld [vmem:[%s1739_s2] sm:$0xff] (!%p138_p2)  ;;  %v169_v1 = vld [vmem:[%s1739_s2 + $0x8] sm:$0xff] (!%p138_p2)  ;;  %v170_v2 = vld [vmem:[%s1739_s2 + $0x10] sm:$0xff] (!%p138_p2)  ;;  %v1376_v3 = vmov (!%p138_p2), 0.0|0.0   ;;  %vm1377_vm0 = vmmov (!%p138_p2), 0   ;;  %v1378_v11 = vmov (!%p138_p2), 0.0  }
   0x7   : > { %141 = sbr.rel (%p138_p2) target bundleno = 323 (0x143), region = 32  ;;  %1203 = vmatprep.subr.bf16.mxu1 (!%p138_p2), %v1376_v3  ;;  %1275 = vmatprep.subr.bf16.mxu0 (!%p138_p2), %v1376_v3  ;;  %v187_v4 = vand.u32 (!%p138_p2), 4294901760, %v168_v0  ;;  %v190_v5 = vand.u32 (!%p138_p2), 4294901760, %v169_v1  ;;  %v171_v6 = vld [vmem:[%s1739_s2 + $0x18] sm:$0xff] (!%p138_p2)  ;;  %v193_v7 = vand.u32 (!%p138_p2), 4294901760, %v170_v2  ;;  %v1427_v9 = vld [vmem:[%s1739_s2 + $0x20] sm:$0xff] (!%p138_p2) }
   0x8   : > { %v196_v8 = vand.u32 (!%p138_p2), 4294901760, %v171_v6  ;;  %v1432_v10 = vld [vmem:[%s1739_s2 + $0x28] sm:$0xff] (!%p138_p2)  ;;  %1025 = vmatprep.mubr.msk.f32.mxu1 (!%p138_p2), %vm1377_vm0, %v1378_v11  ;;  %1130 = vmatprep.mubr.msk.f32.mxu0 (!%p138_p2), %vm1377_vm0, %v1378_v11  ;;  %p159_p3 = scmp.lt.s32.totalorder (!%p138_p2), %s882_s15, 2  ;;  %v199_v14 = vand.u32 (!%p138_p2), 4294901760, %v1427_v9  ;;  %v1453_v16 = vld [vmem:[%s1739_s2 + $0x30] sm:$0xff] (!%p138_p2)  ;;  %v1458_v17 = vld [vmem:[%s1739_s2 + $0x38] sm:$0xff] (!%p138_p2) }
   0x9   : > { %v1438_v12 = vpack.c.bf16 (!%p138_p2), %v190_v5, %v187_v4  ;;  %v202_v15 = vand.u32 (!%p138_p2), 4294901760, %v1432_v10  ;;  %v205_v19 = vand.u32 (!%p138_p2), 4294901760, %v1453_v16  ;;  %v208_v20 = vand.u32 (!%p138_p2), 4294901760, %v1458_v17  ;;  %v1472_v21 = vld [vmem:[%s1739_s2 + $0x40] sm:$0xff] (!%p138_p2)  ;;  %v1477_v22 = vld [vmem:[%s1739_s2 + $0x48] sm:$0xff] (!%p138_p2)  ;;  %v1495_v27 = vld [vmem:[%s1739_s2 + $0x50] sm:$0xff] (!%p138_p2) }
   0xa   : > { %v1442_v13 = vpack.c.bf16 (!%p138_p2), %v196_v8, %v193_v7  ;;  %v211_v24 = vand.u32 (!%p138_p2), 4294901760, %v1472_v21  ;;  %v214_v25 = vand.u32 (!%p138_p2), 4294901760, %v1477_v22  ;;  %v1500_v28 = vld [vmem:[%s1739_s2 + $0x58] sm:$0xff] (!%p138_p2)  ;;  %v1502_v29 = vsub.f32 (!%p138_p2), %v168_v0, %v187_v4  ;;  %v1517_v35 = vld [vmem:[%s1739_s2 + $0x60] sm:$0xff] (!%p138_p2)  ;;  %v1524_v36 = vld [vmem:[%s1739_s2 + $0x68] sm:$0xff] (!%p138_p2)  ;;  %s184_s25 = sld [smem:[#allocation2]] (!%p138_p2) }
   0xb   : > { %1205 = vmatpush3.bf16.msra.mxu1 (!%p138_p2), %v1438_v12  ;;  %1277 = vmatpush3.bf16.msra.mxu0 (!%p138_p2), %v1438_v12  ;;  %v1463_v18 = vpack.c.bf16 (!%p138_p2), %v202_v15, %v199_v14  ;;  %v1486_v23 = vpack.c.bf16 (!%p138_p2), %v208_v20, %v205_v19  ;;  %v1506_v31 = vsub.f32 (!%p138_p2), %v169_v1, %v190_v5  ;;  %v217_v33 = vand.u32 (!%p138_p2), 4294901760, %v1495_v27  ;;  %v1546_v43 = vld [vmem:[%s1739_s2 + $0x70] sm:$0xff] (!%p138_p2)  ;;  %v1551_v44 = vld [vmem:[%s1739_s2 + $0x78] sm:$0xff] (!%p138_p2) }
   0xc   : > { %1206 = vmatprep.subr.bf16.mxu1 (!%p138_p2), %v1376_v3  ;;  %1278 = vmatprep.subr.bf16.mxu0 (!%p138_p2), %v1376_v3  ;;  %v1510_v32 = vpack.c.bf16 (!%p138_p2), %v214_v25, %v211_v24  ;;  %v220_v34 = vand.u32 (!%p138_p2), 4294901760, %v1500_v28  ;;  %v1526_v37 = vsub.f32 (!%p138_p2), %v170_v2, %v193_v7  ;;  %v1528_v38 = vsub.f32 (!%p138_p2), %v171_v6, %v196_v8 }
   0xd   : > { %v223_v39 = vand.u32 (!%p138_p2), 4294901760, %v1517_v35  ;;  %v226_v42 = vand.u32 (!%p138_p2), 4294901760, %v1524_v36  ;;  %v280_v45 = vand.u32 (!%p138_p2), 4294901760, %v1502_v29  ;;  %v287_v46 = vand.u32 (!%p138_p2), 4294901760, %v1506_v31 }
   0xe   : > { %s1742_s15 = smov (!%p159_p3, %s882_s15), 2  ;;  %v1540_v41 = vpack.c.bf16 %v220_v34, %v217_v33  ;;  %v1558_v47 = vsub.f32 %v1427_v9, %v199_v14  ;;  %v1561_v48 = vsub.f32 %v1432_v10, %v202_v15  ;;  %v229_v49 = vand.u32 4294901760, %v1546_v43 }
   0xf   : > { %s887_s4 = sshll.u32 %s1742_s15, 3  ;;  %1208 = vmatpush3.bf16.msra.mxu1 %v1442_v13  ;;  %1280 = vmatpush3.bf16.msra.mxu0 %v1442_v13  ;;  %v232_v50 = vand.u32 4294901760, %v1551_v44  ;;  %v294_v52 = vand.u32 4294901760, %v1526_v37  ;;  %v1573_v53 = vpack.c.bf16 %v226_v42, %v223_v39  ;;  %v281_v54 = vsub.f32 %v1502_v29, %v280_v45 }
  0x10   : > { %1209 = vmatprep.subr.bf16.mxu1 %v1376_v3  ;;  %1281 = vmatprep.subr.bf16.mxu0 %v1376_v3  ;;  %s162_s11 = scalar_lea.vmem %s1738_s1, %s887_s4  ;;  %v288_v55 = vsub.f32 %v1506_v31, %v287_v46  ;;  %v301_v56 = vand.u32 4294901760, %v1528_v38  ;;  %v1581_v57 = vsub.f32 %v1453_v16, %v205_v19  ;;  %v1584_v58 = vsub.f32 %v1458_v17, %v208_v20  ;;  %s166_s28 = scalar_lea.vmem %s1740_s3, %s887_s4 }
  0x11   : > { %v167_v26 = vld [vmem:[%s162_s11] sm:$0xff]  ;;  %v295_v60 = vsub.f32 %v1526_v37, %v294_v52  ;;  %v308_v61 = vand.u32 4294901760, %v1558_v47  ;;  %v315_v62 = vand.u32 4294901760, %v1561_v48  ;;  %v1596_v63 = vpack.c.bf16 %v232_v50, %v229_v49 }
  0x12   : > { %v1504_v30 = vand.u32 4294901760, %v167_v26  ;;  %v282_v0 = vand.u32 4294901760, %v281_v54  ;;  %v289_v1 = vand.u32 4294901760, %v288_v55  ;;  %v302_v2 = vsub.f32 %v1528_v38, %v301_v56 }
  0x13   : > { %1211 = vmatpush3.bf16.msra.mxu1 %v1463_v18  ;;  %1283 = vmatpush3.bf16.msra.mxu0 %v1463_v18  ;;  %v1602_v4 = vsub.f32 %v1472_v21, %v211_v24  ;;  %v1605_v5 = vsub.f32 %v1477_v22, %v214_v25  ;;  %v1300_v6 = vpack.c.bf16 %v287_v46, %v280_v45  ;;  %v296_v8 = vand.u32 4294901760, %v295_v60 }
  0x14   : > { %1212 = vmatprep.subr.bf16.mxu1 %v1376_v3  ;;  %1284 = vmatprep.subr.bf16.mxu0 %v1376_v3  ;;  %v1532_v40 = vsub.f32 %v167_v26, %v1504_v30  ;;  %v309_v9 = vsub.f32 %v1558_v47, %v308_v61  ;;  %v316_v10 = vsub.f32 %v1561_v48, %v315_v62  ;;  %v303_v15 = vand.u32 4294901760, %v302_v2 }
  0x15   : > { %v1228_v14 = vpack.c.bf16 %v289_v1, %v282_v0  ;;  %v322_v16 = vand.u32 4294901760, %v1581_v57  ;;  %v329_v17 = vand.u32 4294901760, %v1584_v58  ;;  %v1618_v19 = vsub.f32 %v1495_v27, %v217_v33 }
  0x16   : > { %v269_v51 = vand.u32 4294901760, %v1532_v40  ;;  %v1623_v20 = vsub.f32 %v1500_v28, %v220_v34  ;;  %v1303_v21 = vpack.c.bf16 %v301_v56, %v294_v52  ;;  %v310_v22 = vand.u32 4294901760, %v309_v9 }
  0x17   : > { %1214 = vmatpush3.bf16.msra.mxu1 %v1486_v23  ;;  %1286 = vmatpush3.bf16.msra.mxu0 %v1486_v23  ;;  %v317_v24 = vand.u32 4294901760, %v316_v10  ;;  %v336_v25 = vand.u32 4294901760, %v1602_v4  ;;  %v1231_v26 = vpack.c.bf16 %v303_v15, %v296_v8  ;;  %v323_v45 = vsub.f32 %v1581_v57, %v322_v16 }
  0x18   : > { %1215 = vmatprep.subr.bf16.mxu1 %v1376_v3  ;;  %1287 = vmatprep.subr.bf16.mxu0 %v1376_v3  ;;  %v270_v59 = vsub.f32 %v1532_v40, %v269_v51  ;;  %v330_v27 = vsub.f32 %v1584_v58, %v329_v17  ;;  %v343_v33 = vand.u32 4294901760, %v1605_v5  ;;  %v1634_v28 = vsub.f32 %v1517_v35, %v223_v39 }
  0x19   : > { %v1639_v34 = vsub.f32 %v1524_v36, %v226_v42  ;;  %v1234_v46 = vpack.c.bf16 %v317_v24, %v310_v22  ;;  %v337_v52 = vsub.f32 %v1602_v4, %v336_v25  ;;  %v350_v54 = vand.u32 4294901760, %v1618_v19 }
  0x1a   : > { %v271_v7 = vand.u32 4294901760, %v270_v59  ;;  %v324_v35 = vand.u32 4294901760, %v323_v45  ;;  %v331_v39 = vand.u32 4294901760, %v330_v27  ;;  %v344_v55 = vsub.f32 %v1605_v5, %v343_v33 }
  0x1b   : > { %1217 = vmatpush3.bf16.msra.mxu1 %v1510_v32  ;;  %1289 = vmatpush3.bf16.msra.mxu0 %v1510_v32  ;;  %v357_v36 = vand.u32 4294901760, %v1623_v20  ;;  %v1654_v42 = vsub.f32 %v1546_v43, %v229_v49  ;;  %v1659_v56 = vsub.f32 %v1551_v44, %v232_v50  ;;  %v1309_v59 = vpack.c.bf16 %v329_v17, %v322_v16 }
  0x1c   : > { %1218 = vmatprep.subr.bf16.mxu1 %v1376_v3  ;;  %1290 = vmatprep.subr.bf16.mxu0 %v1376_v3  ;;  %v338_v60 = vand.u32 4294901760, %v337_v52  ;;  %v1237_v0 = vpack.c.bf16 %v331_v39, %v324_v35  ;;  %v345_v1 = vand.u32 4294901760, %v344_v55  ;;  %v371_v43 = vand.u32 4294901760, %v1639_v34 }
  0x1d   : > { %v358_v2 = vsub.f32 %v1623_v20, %v357_v36  ;;  %v1312_v44 = vpack.c.bf16 %v343_v33, %v336_v25  ;;  %v385_v10 = vand.u32 4294901760, %v1659_v56  ;;  %vm827_vm1 = vcmask 523264  }
  0x1e   : > { %v372_v9 = vsub.f32 %v1639_v34, %v371_v43 }
  0x1f   : > { %1220 = vmatpush3.bf16.msra.mxu1 %v1540_v41  ;;  %1292 = vmatpush3.bf16.msra.mxu0 %v1540_v41  ;;  %v359_v8 = vand.u32 4294901760, %v358_v2  ;;  %v386_v22 = vsub.f32 %v1659_v56, %v385_v10 }
  0x20   : > { %1221 = vmatprep.subr.bf16.mxu1 %v1376_v3  ;;  %1293 = vmatprep.subr.bf16.mxu0 %v1376_v3  ;;  %v373_v17 = vand.u32 4294901760, %v372_v9 }
  0x21   : > { %v387_v45 = vand.u32 4294901760, %v386_v22 }
  0x23   : > { %1223 = vmatpush3.bf16.msra.mxu1 %v1573_v53  ;;  %1295 = vmatpush3.bf16.msra.mxu0 %v1573_v53 }
  0x24   : > { %1224 = vmatprep.subr.bf16.mxu1 %v1376_v3  ;;  %1296 = vmatprep.subr.bf16.mxu0 %v1376_v3 }
  0x27   : > { %1226 = vmatpush3.bf16.msra.mxu1 %v1596_v63  ;;  %1298 = vmatpush3.bf16.msra.mxu0 %v1596_v63 }
  0x28   : > { %1227 = vmatprep.subr.bf16.mxu1 %v1376_v3  ;;  %1299 = vmatprep.subr.bf16.mxu0 %v1376_v3 }
  0x2a   : > { %1026 = vmatmul.mubr.f32.vlgmr.msra.gmra.mrb[0].mxu1 %v271_v7  ;;  %1131 = vmatmul.mubr.f32.vlgmr.msra.gmra.mrb[0].mxu0 %v269_v51  ;;  %v1306_v51 = vpack.c.bf16 %v315_v62, %v308_v61  ;;  %v351_v61 = vsub.f32 %v1618_v19, %v350_v54  ;;  %v364_v62 = vand.u32 4294901760, %v1634_v28  ;;  %v1240_v7 = vpack.c.bf16 %v345_v1, %v338_v60 }
  0x2b   : > { %1229 = vmatpush3.bf16.msra.mxu1 %v1228_v14  ;;  %1301 = vmatpush3.bf16.msra.mxu0 %v1300_v6  ;;  %v378_v6 = vand.u32 4294901760, %v1654_v42  ;;  %v1315_v14 = vpack.c.bf16 %v357_v36, %v350_v54 }
  0x2c   : > { %1230 = vmatprep.subr.bf16.mxu1 %v1376_v3  ;;  %1302 = vmatprep.subr.bf16.mxu0 %v1376_v3  ;;  %v352_v49 = vand.u32 4294901760, %v351_v61  ;;  %v365_v50 = vsub.f32 %v1634_v28, %v364_v62  ;;  %v1318_v25 = vpack.c.bf16 %v371_v43, %v364_v62 }
  0x2d   : > { %1060 = vmatprep.mubr.msk.f32.mxu1 %vm1377_vm0, %v1378_v11  ;;  %1165 = vmatprep.mubr.msk.f32.mxu0 %vm1377_vm0, %v1378_v11  ;;  %v1321_v33 = vpack.c.bf16 %v385_v10, %v378_v6 }
  0x2e   : > { %v366_v15 = vand.u32 4294901760, %v365_v50  ;;  %v1243_v16 = vpack.c.bf16 %v359_v8, %v352_v49 }
  0x2f   : > { %1232 = vmatpush3.bf16.msra.mxu1 %v1231_v26  ;;  %1304 = vmatpush3.bf16.msra.mxu0 %v1303_v21  ;;  %v379_v21 = vsub.f32 %v1654_v42, %v378_v6 }
  0x30   : > { %1233 = vmatprep.subr.bf16.mxu1 %v1376_v3  ;;  %1305 = vmatprep.subr.bf16.mxu0 %v1376_v3  ;;  %v1246_v24 = vpack.c.bf16 %v373_v17, %v366_v15 }
  0x31   : > { %v380_v26 = vand.u32 4294901760, %v379_v21 }
  0x33   : > { %1235 = vmatpush3.bf16.msra.mxu1 %v1234_v46  ;;  %1307 = vmatpush3.bf16.msra.mxu0 %v1306_v51  ;;  %v1249_v27 = vpack.c.bf16 %v387_v45, %v380_v26  ;;  %v1252_v46 = vpack.c.bf16 %v1506_v31, %v1502_v29  ;;  %v1255_v51 = vpack.c.bf16 %v1528_v38, %v1526_v37  ;;  %v185_v31 = vstv %s184_s25 }
  0x34   : > { %1236 = vmatprep.subr.bf16.mxu1 %v1376_v3  ;;  %1308 = vmatprep.subr.bf16.mxu0 %v1376_v3  ;;  %v1258_v29 = vpack.c.bf16 %v1561_v48, %v1558_v47 }
  0x37   : > { %1238 = vmatpush3.bf16.msra.mxu1 %v1237_v0  ;;  %1310 = vmatpush3.bf16.msra.mxu0 %v1309_v59 }
  0x38   : > { %1239 = vmatprep.subr.bf16.mxu1 %v1376_v3  ;;  %1311 = vmatprep.subr.bf16.mxu0 %v1376_v3 }
  0x3b   : > { %1241 = vmatpush3.bf16.msra.mxu1 %v1240_v7  ;;  %1313 = vmatpush3.bf16.msra.mxu0 %v1312_v44 }
  0x3c   : > { %1242 = vmatprep.subr.bf16.mxu1 %v1376_v3  ;;  %1314 = vmatprep.subr.bf16.mxu0 %v1376_v3 }
  0x3f   : > { %1244 = vmatpush3.bf16.msra.mxu1 %v1243_v16  ;;  %1316 = vmatpush3.bf16.msra.mxu0 %v1315_v14 }
  0x40   : > { %1245 = vmatprep.subr.bf16.mxu1 %v1376_v3  ;;  %1317 = vmatprep.subr.bf16.mxu0 %v1376_v3 }
  0x43   : > { %1247 = vmatpush3.bf16.msra.mxu1 %v1246_v24  ;;  %1319 = vmatpush3.bf16.msra.mxu0 %v1318_v25 }
  0x44   : > { %1248 = vmatprep.subr.bf16.mxu1 %v1376_v3  ;;  %1320 = vmatprep.subr.bf16.mxu0 %v1376_v3 }
  0x47   : > { %1250 = vmatpush3.bf16.msra.mxu1 %v1249_v27  ;;  %1322 = vmatpush3.bf16.msra.mxu0 %v1321_v33 }
  0x48   : > { %1251 = vmatprep.subr.bf16.mxu1 %v1376_v3  ;;  %1323 = vmatprep.subr.bf16.mxu0 %v1376_v3 }
  0x4a   : > { %1061 = vmatmul.mubr.f32.vlgmr.msra.gmra.mrb[0].mxu1 %v1504_v30  ;;  %1166 = vmatmul.mubr.f32.vlgmr.msra.gmra.mrb[0].mxu0 %v1504_v30 }
  0x4b   : > { %1253 = vmatpush3.bf16.msra.mxu1 %v1252_v46  ;;  %1325 = vmatpush3.bf16.msra.mxu0 %v1438_v12  ;;  %v1261_v12 = vpack.c.bf16 %v1584_v58, %v1581_v57 }
  0x4c   : > { %1254 = vmatprep.subr.bf16.mxu1 %v1376_v3  ;;  %1326 = vmatprep.subr.bf16.mxu0 %v1376_v3 }
  0x4d   : > { %1095 = vmatprep.mubr.msk.f32.mxu1 %vm1377_vm0, %v1378_v11  ;;  %1200 = vmatprep.mubr.msk.f32.mxu0 %vm1377_vm0, %v1378_v11  ;;  %v1264_v11 = vpack.c.bf16 %v1605_v5, %v1602_v4 }
  0x4f   : > { %1256 = vmatpush3.bf16.msra.mxu1 %v1255_v51  ;;  %1328 = vmatpush3.bf16.msra.mxu0 %v1442_v13  ;;  %v1267_v13 = vpack.c.bf16 %v1623_v20, %v1618_v19 }
  0x50   : > { %1257 = vmatprep.subr.bf16.mxu1 %v1376_v3  ;;  %1329 = vmatprep.subr.bf16.mxu0 %v1376_v3 }
  0x53   : > { %1259 = vmatpush3.bf16.msra.mxu1 %v1258_v29  ;;  %1331 = vmatpush3.bf16.msra.mxu0 %v1463_v18  ;;  %v1270_v18 = vpack.c.bf16 %v1639_v34, %v1634_v28 }
  0x54   : > { %1260 = vmatprep.subr.bf16.mxu1 %v1376_v3  ;;  %1332 = vmatprep.subr.bf16.mxu0 %v1376_v3 }
  0x57   : > { %1262 = vmatpush3.bf16.msra.mxu1 %v1261_v12  ;;  %1334 = vmatpush3.bf16.msra.mxu0 %v1486_v23  ;;  %v1273_v23 = vpack.c.bf16 %v1659_v56, %v1654_v42 }
  0x58   : > { %1263 = vmatprep.subr.bf16.mxu1 %v1376_v3  ;;  %1335 = vmatprep.subr.bf16.mxu0 %v1376_v3 }
  0x5b   : > { %1265 = vmatpush3.bf16.msra.mxu1 %v1264_v11  ;;  %1337 = vmatpush3.bf16.msra.mxu0 %v1510_v32 }
  0x5c   : > { %1266 = vmatprep.subr.bf16.mxu1 %v1376_v3  ;;  %1338 = vmatprep.subr.bf16.mxu0 %v1376_v3 }
  0x5f   : > { %1268 = vmatpush3.bf16.msra.mxu1 %v1267_v13  ;;  %1340 = vmatpush3.bf16.msra.mxu0 %v1540_v41 }
  0x60   : > { %1269 = vmatprep.subr.bf16.mxu1 %v1376_v3  ;;  %1341 = vmatprep.subr.bf16.mxu0 %v1376_v3 }
  0x63   : > { %1271 = vmatpush3.bf16.msra.mxu1 %v1270_v18  ;;  %1343 = vmatpush3.bf16.msra.mxu0 %v1573_v53 }
  0x64   : > { %1272 = vmatprep.subr.bf16.mxu1 %v1376_v3  ;;  %1344 = vmatprep.subr.bf16.mxu0 %v1376_v3 }
  0x67   : > { %1274 = vmatpush3.bf16.msra.mxu1 %v1273_v23  ;;  %1346 = vmatpush3.bf16.msra.mxu0 %v1596_v63 }
  0x6a   : > { %1096 = vmatmul.mubr.f32.vlgmr.msra.gmra.mrb[0].mxu1 %v1532_v40  ;;  %1201 = vmatmul.mubr.f32.vlgmr.msra.gmra.mrb[0].mxu0 %v1504_v30 }
 0x13d   : > { %v528_v32 = vpop.f32.mrb[0].mxu1  ;;  %v823_v37 = vpop.f32.mrb[0].mxu0 }
 0x13e   : > { %v1347_v38 = vadd.f32 %v528_v32, %v185_v31  ;;  %v1097_v41 = vpop.f32.mrb[1].mxu1  ;;  %v1202_v47 = vpop.f32.mrb[1].mxu0 }
 0x140   : > { %v1348_v3 = vadd.f32 %v1347_v38, %v823_v37 }
 0x142   : > { %828 = vst.msk [vmem:[%s166_s28] sm:$0xff] %vm827_vm1, %v1348_v3 }
 0x143 PF: > { %s14_s14 = sadd.s32 1, %s1374_s14  }
 0x144   : > { %p11_p4 = scmp.ge.s32.totalorder %s14_s14, 5  }
 0x146   :  { %13 = sbr.rel (!%p11_p4) target bundleno = 2 (0x2), region = 62 }

</bundles_post_ra>
